<compile_context>
chip_gen: v7x
topology: tpu7x:2x2x1
jax: 0.10.0
libtpu: 0.0.40
codegen_flags: <defaults>
</compile_context>

<pallas_src>
import numpy as np
import jax
import jax.numpy as jnp
from jax import lax
from jax.experimental import pallas as pl
from jax.experimental.pallas import tpu as pltpu

_BIG_NORM = 1e30   # squared-norm pad value -> exp(-gamma*dnorm2) == 0 for padded cols


# ---------------------------------------------------------------------------
# Small helpers: alignment, VMEM budgeting.
# ---------------------------------------------------------------------------
def _round_up(x, m):
    return ((x + m - 1) // m) * m


def _pick_tile(n, preferred, align):
    return preferred if n >= preferred else _round_up(n, align)


def _vmem_limit_bytes():
    """~75% of physical VMEM: ~96 MiB on v5e/v6e (128 MiB), ~48 MiB on v7x (64 MiB)."""
    try:
        cap = pltpu.get_tpu_info().vmem_capacity_bytes
        return int(min(96 * 1024 * 1024, cap * 3 // 4))
    except Exception:
        return 48 * 1024 * 1024


def _footprint_bytes(tm, tcols, dp, shared):
    """Double-buffered per-step VMEM footprint of the fused kernel (f32 words)."""
    ncol = 1 if shared else 2
    per_step = (tm * dp              # X row tile
                + ncol * tcols * dp  # Y (+ Xc) column tile(s)
                + tm + tcols         # ||x||^2, ||y||^2
                + tm * tcols         # kxy output tile
                + tm * dp)           # dxkxy output tile
    return 2 * per_step * 4


def _shrink_tiles(tm, tk, dp, shared, budget):
    """Safety net for very large feature dims: shrink tiles to fit the budget."""
    while _footprint_bytes(tm, tk, dp, shared) > budget and tk > 128:
        tk = max(128, _round_up(tk // 2, 128))
    while _footprint_bytes(tm, tk, dp, shared) > budget and tm > 8:
        tm = max(8, _round_up(tm // 2, 8))
    return tm, tk


# ---------------------------------------------------------------------------
# Kernel A: tiled dnorm2 (only for the sigma=None median heuristic).
# ---------------------------------------------------------------------------
def _dnorm2_kernel(x_ref, y_ref, xx_ref, yy_ref, out_ref):
    # X @ Y.T without an explicit transpose: contract on the feature dim.
    xy = lax.dot_general(
        x_ref[...], y_ref[...],
        dimension_numbers=(((1,), (1,)), ((), ())),
        preferred_element_type=jnp.float32)                    # (tm, tk)
    out_ref[...] = -2.0 * xy + xx_ref[...] + yy_ref[...]


def _dnorm2(x_rows, y_cols, xx_col, yy_row, tm, tk, vmem_limit):
    pn, dp = x_rows.shape
    pm = y_cols.shape[0]
    return pl.pallas_call(
        _dnorm2_kernel,
        out_shape=jax.ShapeDtypeStruct((pn, pm), jnp.float32),
        grid=(pn // tm, pm // tk),
        in_specs=[
            pl.BlockSpec((tm, dp), lambda i, j: (i, 0)),        # X row tile
            pl.BlockSpec((tk, dp), lambda i, j: (j, 0)),        # Y row tile
            pl.BlockSpec((tm, 1), lambda i, j: (i, 0)),         # ||x||^2
            pl.BlockSpec((1, tk), lambda i, j: (0, j)),         # ||y||^2
        ],
        out_specs=pl.BlockSpec((tm, tk), lambda i, j: (i, j)),
        compiler_params=pltpu.CompilerParams(
            dimension_semantics=("parallel", "parallel"),
            vmem_limit_bytes=vmem_limit),
    )(x_rows, y_cols, xx_col, yy_row)


# ---------------------------------------------------------------------------
# Kernel B, variant 1: "resident" (collapse-k).  Whole column set in VMEM,
# 1-D grid over row tiles, no scratch accumulators.
# ---------------------------------------------------------------------------
def _make_resident_kernel(shared, mx_dtype):
    def kernel(*refs):
        if shared:
            gamma_ref, x_ref, y_ref, xx_ref, yy_ref, kxy_ref, dxkxy_ref = refs
            xc_ref = y_ref                       # X == Y: reuse the same stream
        else:
            gamma_ref, x_ref, y_ref, xc_ref, xx_ref, yy_ref, kxy_ref, dxkxy_ref = refs
        gamma = gamma_ref[0]
        x = x_ref[...]                                           # (tm, Dp)
        xy = lax.dot_general(
            x, y_ref[...],
            dimension_numbers=(((1,), (1,)), ((), ())),
            preferred_element_type=jnp.float32)                  # (tm, pm)
        dnorm2 = -2.0 * xy + xx_ref[...] + yy_ref[...]
        kxy = jnp.exp(-gamma * dnorm2)       # padded cols: yy==1e30 -> kxy==0
        kxy_ref[...] = kxy
        s = jnp.sum(kxy, axis=1, keepdims=True)
        # bf16 MXU operands + f32 accumulation (flash-attention pattern).
        acc = jnp.dot(kxy.astype(mx_dtype), xc_ref[...].astype(mx_dtype),
                      preferred_element_type=jnp.float32)
        dxkxy_ref[...] = (x * s - acc) * (2.0 * gamma)
    return kernel


def _kxy_dxkxy_resident(gamma_arr, x_rows, y_cols, x_cols, xx_col, yy_row,
                        tm, mx_dtype, vmem_limit):
    shared = x_cols is None
    pn, dp = x_rows.shape
    pm = y_cols.shape[0]
    in_specs = [pl.BlockSpec(memory_space=pltpu.MemorySpace.SMEM),   # gamma
                pl.BlockSpec((tm, dp), lambda i: (i, 0)),            # X rows
                pl.BlockSpec((pm, dp), lambda i: (0, 0))]            # Y (resident)
    args = [gamma_arr, x_rows, y_cols]
    if not shared:
        in_specs.append(pl.BlockSpec((pm, dp), lambda i: (0, 0)))    # Xc (resident)
        args.append(x_cols)
    in_specs += [pl.BlockSpec((tm, 1), lambda i: (i, 0)),            # ||x||^2
                 pl.BlockSpec((1, pm), lambda i: (0, 0))]            # ||y||^2 (BIG-padded)
    args += [xx_col, yy_row]
    return pl.pallas_call(
        _make_resident_kernel(shared, mx_dtype),
        out_shape=(jax.ShapeDtypeStruct((pn, pm), jnp.float32),      # kxy
                   jax.ShapeDtypeStruct((pn, dp), jnp.float32)),     # dxkxy
        grid=(pn // tm,),
        in_specs=in_specs,
        out_specs=(pl.BlockSpec((tm, pm), lambda i: (i, 0)),
                   pl.BlockSpec((tm, dp), lambda i: (i, 0))),
        compiler_params=pltpu.CompilerParams(
            dimension_semantics=("parallel",),
            vmem_limit_bytes=vmem_limit),
    )(*args)


# ---------------------------------------------------------------------------
# Kernel B, variant 2: k-tiled with VMEM scratch accumulators.
# ---------------------------------------------------------------------------
def _make_tiled_kernel(shared, mx_dtype):
    def kernel(*refs):
        if shared:
            (gamma_ref, x_ref, y_ref, xx_ref, yy_ref,
             kxy_ref, dxkxy_ref, acc_ref, sum_ref) = refs
            xc_ref = y_ref                       # X == Y: reuse the same stream
        else:
            (gamma_ref, x_ref, y_ref, xc_ref, xx_ref, yy_ref,
             kxy_ref, dxkxy_ref, acc_ref, sum_ref) = refs
        k = pl.program_id(1)

        @pl.when(k == 0)
        def _init():
            acc_ref[...] = jnp.zeros_like(acc_ref)
            sum_ref[...] = jnp.zeros_like(sum_ref)

        gamma = gamma_ref[0]
        x = x_ref[...]                                           # (tm, Dp)
        xy = lax.dot_general(
            x, y_ref[...],
            dimension_numbers=(((1,), (1,)), ((), ())),
            preferred_element_type=jnp.float32)                  # (tm, tk)
        dnorm2 = -2.0 * xy + xx_ref[...] + yy_ref[...]
        kxy = jnp.exp(-gamma * dnorm2)       # padded cols: yy==1e30 -> kxy==0
        kxy_ref[...] = kxy
        sum_ref[...] += jnp.sum(kxy, axis=1, keepdims=True)
        acc_ref[...] += jnp.dot(kxy.astype(mx_dtype), xc_ref[...].astype(mx_dtype),
                                preferred_element_type=jnp.float32)

        @pl.when(k == pl.num_programs(1) - 1)
        def _finalize():
            dxkxy_ref[...] = (x * sum_ref[...] - acc_ref[...]) * (2.0 * gamma)
    return kernel


def _kxy_dxkxy_tiled(gamma_arr, x_rows, y_cols, x_cols, xx_col, yy_row,
                     tm, tk, mx_dtype, vmem_limit):
    shared = x_cols is None
    pn, dp = x_rows.shape
    pm = y_cols.shape[0]
    in_specs = [pl.BlockSpec(memory_space=pltpu.MemorySpace.SMEM),   # gamma
                pl.BlockSpec((tm, dp), lambda i, k: (i, 0)),         # X rows (i)
                pl.BlockSpec((tk, dp), lambda i, k: (k, 0))]         # Y rows (k)
    args = [gamma_arr, x_rows, y_cols]
    if not shared:
        in_specs.append(pl.BlockSpec((tk, dp), lambda i, k: (k, 0)))  # X rows (k)
        args.append(x_cols)
    in_specs += [pl.BlockSpec((tm, 1), lambda i, k: (i, 0)),          # ||x||^2
                 pl.BlockSpec((1, tk), lambda i, k: (0, k))]          # ||y||^2 (BIG-padded)
    args += [xx_col, yy_row]
    return pl.pallas_call(
        _make_tiled_kernel(shared, mx_dtype),
        out_shape=(jax.ShapeDtypeStruct((pn, pm), jnp.float32),       # kxy
                   jax.ShapeDtypeStruct((pn, dp), jnp.float32)),      # dxkxy
        grid=(pn // tm, pm // tk),                                    # reduction axis LAST
        in_specs=in_specs,
        out_specs=(pl.BlockSpec((tm, tk), lambda i, k: (i, k)),       # kxy tile
                   pl.BlockSpec((tm, dp), lambda i, k: (i, 0))),      # dxkxy resident over k
        scratch_shapes=[pltpu.VMEM((tm, dp), jnp.float32),            # kxy @ X accumulator
                        pltpu.VMEM((tm, 1), jnp.float32)],            # sum(kxy) accumulator
        compiler_params=pltpu.CompilerParams(
            dimension_semantics=("parallel", "arbitrary"),
            vmem_limit_bytes=vmem_limit),
    )(*args)


# ---------------------------------------------------------------------------
# Wrapper: padding / alignment, sigma heuristic, variant selection.
# ---------------------------------------------------------------------------
def rbf_forward(x, y, sigma=None, *, tm_pref=512, tk_pref=1024,
                matmul_dtype=jnp.bfloat16, collapse=None):
    """Pallas equivalent of RBF(sigma).forward(X, Y). Returns (kxy, dxkxy)."""
    shared = x is y                      # SVGD always calls with Y = X
    x = jnp.asarray(x, jnp.float32)
    y = x if shared else jnp.asarray(y, jnp.float32)
    n, d = x.shape
    m = y.shape[0]
    if m != n:
        # The reference module implicitly requires this for kxy @ X.
        raise ValueError("RBF.forward requires X.shape[0] == Y.shape[0]")

    vmem_limit = _vmem_limit_bytes()
    budget = int(vmem_limit * 0.8)       # headroom under the scoped limit

    # Lane-dense layout: feature dim padded to a multiple of 128, rows to 8.
    dp = _round_up(d, 128)
    tm = _pick_tile(n, tm_pref, 8)

    # Column handling: collapse the reduction axis entirely if the padded
    # column set fits in VMEM (typical SVGD sizes), else stream column tiles.
    pm128 = _round_up(m, 128)
    if collapse is None:
        collapse = _footprint_bytes(tm, pm128, dp, shared) <= budget
    if collapse:
        tk = pm = pm128
    else:
        tk = _pick_tile(m, tk_pref, 128)
        tm, tk = _shrink_tiles(tm, tk, dp, shared, budget)
        pm = _round_up(m, tk)
    pn = _round_up(n, tm)

    # Zero-padded operands (padded feature columns are zero -> no effect).
    x_rows = jnp.zeros((pn, dp), jnp.float32).at[:n, :d].set(x)
    y_cols = jnp.zeros((pm, dp), jnp.float32).at[:m, :d].set(y)
    x_cols = None if shared else jnp.zeros((pm, dp), jnp.float32).at[:n, :d].set(x)

    # Hoisted row norms (computed once in plain JAX, tiny).
    xx = jnp.sum(x * x, axis=1, keepdims=True)                  # (n, 1)
    yy = xx[:, 0] if shared else jnp.sum(y * y, axis=1)         # (m,)
    xx_col = jnp.zeros((pn, 1), jnp.float32).at[:n].set(xx)
    yy_row = jnp.full((1, pm), _BIG_NORM, jnp.float32).at[0, :m].set(yy)

    if sigma is None:
        dnorm2 = _dnorm2(x_rows, y_cols, xx_col, yy_row, tm, tk, vmem_limit)[:n, :m]
        # TODO(synk): exact full-matrix median (sort-based) has no clean Pallas
        # equivalent; kept in plain JAX (matches np.median in the reference).
        h = jnp.median(dnorm2) / (2.0 * np.log(n + 1))
        sigma_val = jnp.sqrt(h)
    else:
        sigma_val = jnp.asarray(sigma, jnp.float32)

    gamma = 1.0 / (1e-08 + 2.0 * sigma_val ** 2)
    gamma_arr = jnp.asarray(gamma, jnp.float32).reshape((1,))

    if collapse:
        kxy_p, dxkxy_p = _kxy_dxkxy_resident(
            gamma_arr, x_rows, y_cols, x_cols, xx_col, yy_row,
            tm, matmul_dtype, vmem_limit)
    else:
        kxy_p, dxkxy_p = _kxy_dxkxy_tiled(
            gamma_arr, x_rows, y_cols, x_cols, xx_col, yy_row,
            tm, tk, matmul_dtype, vmem_limit)
    return kxy_p[:n, :m], dxkxy_p[:n, :d]


def _rbf_reference(x, y, sigma=None):
    """Plain-JAX reference mirroring the PyTorch module (for self-check)."""
    xy = x @ y.T
    xx = jnp.sum(x * x, axis=1, keepdims=True)
    yy = jnp.sum(y * y, axis=1)[None, :]
    dnorm2 = -2.0 * xy + xx + yy
    if sigma is None:
        h = jnp.median(dnorm2) / (2.0 * np.log(x.shape[0] + 1))
        sigma = jnp.sqrt(h)
    gamma = 1.0 / (1e-08 + 2.0 * sigma ** 2)
    kxy = jnp.exp(-gamma * dnorm2)
    dxkxy = (-kxy @ x + x * jnp.sum(kxy, axis=1, keepdims=True)) * 2.0 * gamma
    return kxy, dxkxy


if __name__ == "__main__":
    key = jax.random.PRNGKey(0)
    kx, ky = jax.random.split(key)
    N, D = 16, 32
    X = jax.random.normal(kx, (N, D), dtype=jnp.float32)
    Y = X   # SVGD uses the same particle set for both arguments

    # 1) median-heuristic sigma, shared X==Y, resident (collapse-k), bf16 MXU.
    kxy, dxkxy = rbf_forward(X, Y, sigma=None)
    jax.block_until_ready((kxy, dxkxy))
    assert kxy.shape == (N, N) and dxkxy.shape == (N, D)
    assert bool(jnp.all(jnp.isfinite(kxy))) and bool(jnp.all(jnp.isfinite(dxkxy)))
    kxy_ref, dxkxy_ref = _rbf_reference(X, Y, sigma=None)
    np.testing.assert_allclose(np.asarray(kxy), np.asarray(kxy_ref),
                               rtol=2e-3, atol=2e-3)
    np.testing.assert_allclose(np.asarray(dxkxy), np.asarray(dxkxy_ref),
                               rtol=1e-2, atol=1e-2)   # bf16 MXU operands

    # 2) fixed sigma, f32 MXU accumulation path (tight tolerance, no bf16).
    kxy2, dxkxy2 = rbf_forward(X, Y, sigma=1.0, matmul_dtype=jnp.float32)
    jax.block_until_ready((kxy2, dxkxy2))
    kxy2_ref, dxkxy2_ref = _rbf_reference(X, Y, sigma=1.0)
    np.testing.assert_allclose(np.asarray(kxy2), np.asarray(kxy2_ref),
                               rtol=2e-3, atol=2e-3)
    np.testing.assert_allclose(np.asarray(dxkxy2), np.asarray(dxkxy2_ref),
                               rtol=2e-3, atol=2e-3)

    # 3) distinct Y (non-deduped stream), fixed sigma.
    Y3 = jax.random.normal(ky, (N, D), dtype=jnp.float32)
    kxy3, dxkxy3 = rbf_forward(X, Y3, sigma=4.0)
    jax.block_until_ready((kxy3, dxkxy3))
    kxy3_ref, dxkxy3_ref = _rbf_reference(X, Y3, sigma=4.0)
    np.testing.assert_allclose(np.asarray(kxy3), np.asarray(kxy3_ref),
                               rtol=2e-3, atol=2e-3)
    np.testing.assert_allclose(np.asarray(dxkxy3), np.asarray(dxkxy3_ref),
                               rtol=1e-2, atol=1e-2)

    # 4) force the k-tiled accumulator path (2 column tiles) at a larger size.
    N4 = 200
    X4 = jax.random.normal(jax.random.PRNGKey(1), (N4, D), dtype=jnp.float32)
    kxy4, dxkxy4 = rbf_forward(X4, X4, sigma=None, tk_pref=128, collapse=False)
    jax.block_until_ready((kxy4, dxkxy4))
    kxy4_ref, dxkxy4_ref = _rbf_reference(X4, X4, sigma=None)
    np.testing.assert_allclose(np.asarray(kxy4), np.asarray(kxy4_ref),
                               rtol=2e-3, atol=2e-3)
    np.testing.assert_allclose(np.asarray(dxkxy4), np.asarray(dxkxy4_ref),
                               rtol=1e-2, atol=1e-2)

    print("KERNEL_OK")
</pallas_src>

<mosaic_0001>
module attributes {stable_mosaic.version = 11 : i64} {
  func.func @_dnorm2_kernel(%arg0: i32, %arg1: i32, %arg2: memref<16x128xf32, #tpu.memory_space<vmem>>, %arg3: memref<128x128xf32, #tpu.memory_space<vmem>>, %arg4: memref<16x1xf32, #tpu.memory_space<vmem>>, %arg5: memref<1x128xf32, #tpu.memory_space<vmem>>, %arg6: memref<16x128xf32, #tpu.memory_space<vmem>>) attributes {dimension_semantics = [#tpu.dimension_semantics<parallel>, #tpu.dimension_semantics<parallel>], iteration_bounds = array<i64: 1, 1>, scalar_prefetch = 0 : i64, scratch_operands = 0 : i64, tpu.core_type = #tpu.core_type<tc>, window_params = [{transform_indices = @transform_0, window_bounds = array<i64: 16, 128>}, {transform_indices = @transform_1, window_bounds = array<i64: 128, 128>}, {transform_indices = @transform_2, window_bounds = array<i64: 16, 1>}, {transform_indices = @transform_3, window_bounds = array<i64: 1, 128>}, {transform_indices = @transform_4, window_bounds = array<i64: 16, 128>}]} {
    %c0 = arith.constant 0 : index
    %c0_0 = arith.constant 0 : index
    %0 = vector.load %arg2[%c0, %c0_0] : memref<16x128xf32, #tpu.memory_space<vmem>>, vector<16x128xf32>
    %c0_1 = arith.constant 0 : index
    %c0_2 = arith.constant 0 : index
    %1 = vector.load %arg3[%c0_1, %c0_2] : memref<128x128xf32, #tpu.memory_space<vmem>>, vector<128x128xf32>
    %cst = arith.constant dense<0.000000e+00> : vector<16x128xf32>
    %2 = tpu.matmul %0, %1, %cst {dimension_numbers = #tpu.dot_dimension_numbers<[1], [1], [0], [0], [0, 0, 1, 0], [], []>} : vector<16x128xf32>, vector<128x128xf32>, vector<16x128xf32> -> vector<16x128xf32>
    %cst_3 = arith.constant -2.000000e+00 : f32
    %3 = vector.broadcast %cst_3 : f32 to vector<16x128xf32>
    %4 = arith.mulf %3, %2 : vector<16x128xf32>
    %c0_4 = arith.constant 0 : index
    %c0_5 = arith.constant 0 : index
    %5 = vector.load %arg4[%c0_4, %c0_5] : memref<16x1xf32, #tpu.memory_space<vmem>>, vector<16x1xf32>
    %6 = vector.broadcast %5 : vector<16x1xf32> to vector<16x128xf32>
    %7 = arith.addf %4, %6 : vector<16x128xf32>
    %c0_6 = arith.constant 0 : index
    %c0_7 = arith.constant 0 : index
    %8 = vector.load %arg5[%c0_6, %c0_7] : memref<1x128xf32, #tpu.memory_space<vmem>>, vector<1x128xf32>
    %9 = vector.broadcast %8 : vector<1x128xf32> to vector<16x128xf32>
    %10 = arith.addf %7, %9 : vector<16x128xf32>
    %c0_8 = arith.constant 0 : index
    %c0_9 = arith.constant 0 : index
    %11 = vector.load %arg6[%c0_8, %c0_9] : memref<16x128xf32, #tpu.memory_space<vmem>>, vector<16x128xf32>
    tpu.vector_store %arg6[%c0_8, %c0_9], %10 {strides = array<i32>} : memref<16x128xf32, #tpu.memory_space<vmem>>, vector<16x128xf32>,
    return
  }
  func.func @transform_0(%arg0: i32, %arg1: i32) -> (i32, i32) {
    %c0_i32 = arith.constant 0 : i32
    %c0_i32_0 = arith.constant 0 : i32
    return %arg0, %c0_i32 : i32, i32
  }
  func.func @transform_1(%arg0: i32, %arg1: i32) -> (i32, i32) {
    %c0_i32 = arith.constant 0 : i32
    %c0_i32_0 = arith.constant 0 : i32
    return %arg1, %c0_i32 : i32, i32
  }
  func.func @transform_2(%arg0: i32, %arg1: i32) -> (i32, i32) {
    %c0_i32 = arith.constant 0 : i32
    %c0_i32_0 = arith.constant 0 : i32
    return %arg0, %c0_i32 : i32, i32
  }
  func.func @transform_3(%arg0: i32, %arg1: i32) -> (i32, i32) {
    %c0_i32 = arith.constant 0 : i32
    %c0_i32_0 = arith.constant 0 : i32
    return %c0_i32, %arg1 : i32, i32
  }
  func.func @transform_4(%arg0: i32, %arg1: i32) -> (i32, i32) {
    %c0_i32 = arith.constant 0 : i32
    return %arg0, %arg1 : i32, i32
  }
}

</mosaic_0001>

<bundles_post_ra>
// kernel: tpu_custom_call.1
= control target key start
LH: loop header
LB: loop body
LE: loop exit
PB: predicated region body
PF: predicated region fallthrough
CT: control target
= control target key end

     0   :  { %9 = vsyncpa [#allocation3], 0  ;;  %s384_s0 = inlined_call_operand.vmem [shape: f32[16,128], index: 0, kind: input, shape index: {}]   ;;  %s385_s1 = inlined_call_operand.hbm [shape: f32[128,128], index: 1, kind: input, shape index: {}]   ;;  %s386_s2 = inlined_call_operand.vmem [shape: f32[16,1], index: 2, kind: input, shape index: {}]   ;;  %s387_s3 = inlined_call_operand.vmem [shape: f32[1,128], index: 3, kind: input, shape index: {}]   ;;  %s388_s4 = inlined_call_operand.hbm [shape: f32[16,128], index: 4, kind: output, shape index: {}]  }
   0x1   :  { %10 = vsyncpa [#allocation4], 0  ;;  %s309_s15 = smov [#allocation2]   ;;  %s261_s19 = scalar_lea.hbm %s385_s1, 2048 }
   0x2   :  { %s18_s16 = sshll.u32 %s309_s15, 4  ;;  %p262_p0 = scmp.ne.s32.totalorder %s385_s1, %s261_s19  ;;  %s19_s16 = int_to_ptr.vmem [resolvable:$true] %s18_s16 }
   0x3   :  { %p265_p1 = scmp.lt.u32.totalorder %s261_s19, %s385_s1 }
   0x5   :  { %p267_p2 = pnand %p265_p1, %p262_p0 }
   0x7   :  { %270 = shalt.err (!%p267_p2)
}
   0x8   :  { %s271_s24 = scalar_lea.vmem %s19_s16, 2048  ;;  %p276_p4 = scmp.lt.s32.totalorder %s19_s16, %s19_s16 }
   0x9   :  { %p272_p3 = scmp.ne.s32.totalorder %s19_s16, %s271_s24  ;;  %p277_p5 = scmp.lt.s32.totalorder %s271_s24, %s271_s24 }
   0xb   :  { %p278_p6 = por %p277_p5, %p276_p4 }
   0xd   :  { %p279_p7 = pnand %p278_p6, %p272_p3 }
   0xf   :  { %282 = shalt.err (!%p279_p7)
}
  0x10   :  { %s310_s25 = smov 128   ;;  %s311_s26 = smov 8  }
  0x11   :  { %24 = dma.hbm_to_vmem [thread:$0]  %s385_s1, 2048, %s19_s16, [#allocation3], %s310_s25, %s310_s25, %s311_s26  }
  0x12   :  { %305 = dma.done.wait [#allocation3], 2048  }
  0x13   :  { %306 = vsyncadd [#allocation3], 4294965248  ;;  %v312_v0 = vmov 0   ;;  %v34_v1 = vld [vmem:[#allocation2] sm:$0xff]  ;;  %v35_v2 = vld [vmem:[#allocation2 + $0x8] sm:$0xff]  ;;  %s313_s11 = smov [#allocation5]  }
  0x14   :  { %260 = vset.pattern.permute.xlu0 %v312_v0  ;;  %v36_v3 = vld [vmem:[#allocation2 + $0x10] sm:$0xff]  ;;  %v223_v4 = vpack.c.bf16 %v35_v2, %v34_v1  ;;  %v37_v5 = vld [vmem:[#allocation2 + $0x18] sm:$0xff]  ;;  %v32_v7 = vld [vmem:[%s384_s0] sm:$0xff]  ;;  %s157_s12 = sshll.u32 %s313_s11, 4  ;;  %s158_s12 = int_to_ptr.vmem [resolvable:$true] %s157_s12 }
  0x15   :  { %v227_v6 = vpack.c.bf16 %v37_v5, %v36_v3  ;;  %v38_v8 = vld [vmem:[#allocation2 + $0x20] sm:$0xff]  ;;  %v39_v9 = vld [vmem:[#allocation2 + $0x28] sm:$0xff]  ;;  %220 = vmatprep.mubr.f32.mxu0 %v32_v7  ;;  %v40_v13 = vld [vmem:[#allocation2 + $0x30] sm:$0xff]  ;;  %p288_p9 = scmp.lt.s32.totalorder %s158_s12, %s158_s12 }
  0x16   :  { %224 = vmatprep.subr.bf16.mxu0 %v223_v4  ;;  %v127_v10 = vld [vmem:[%s386_s2] sm:$0xff]  ;;  %v128_v11 = vld [vmem:[%s386_s2 + $0x8] sm:$0xff]  ;;  %v231_v12 = vpack.c.bf16 %v39_v9, %v38_v8  ;;  %v41_v14 = vld [vmem:[#allocation2 + $0x38] sm:$0xff] }
  0x17   :  { %226 = vmatpush3.bf16.xpose.msra.mxu0 %v223_v4  ;;  %131 = vperm.xlu0 %260, %v127_v10   ;;  %v235_v15 = vpack.c.bf16 %v41_v14, %v40_v13  ;;  %v42_v16 = vld [vmem:[#allocation2 + $0x40] sm:$0xff]  ;;  %v43_v17 = vld [vmem:[#allocation2 + $0x48] sm:$0xff]  ;;  %v44_v19 = vld [vmem:[#allocation2 + $0x50] sm:$0xff] }
  0x18   :  { %228 = vmatprep.subr.bf16.mxu0 %v227_v6  ;;  %v239_v18 = vpack.c.bf16 %v43_v17, %v42_v16  ;;  %v45_v20 = vld [vmem:[#allocation2 + $0x58] sm:$0xff]  ;;  %v46_v22 = vld [vmem:[#allocation2 + $0x60] sm:$0xff]  ;;  %v47_v23 = vld [vmem:[#allocation2 + $0x68] sm:$0xff] }
  0x19   :  { %v243_v21 = vpack.c.bf16 %v45_v20, %v44_v19  ;;  %v247_v24 = vpack.c.bf16 %v47_v23, %v46_v22  ;;  %v48_v25 = vld [vmem:[#allocation2 + $0x70] sm:$0xff]  ;;  %v49_v26 = vld [vmem:[#allocation2 + $0x78] sm:$0xff]  ;;  %v33_v28 = vld [vmem:[%s384_s0 + $0x8] sm:$0xff]  ;;  %s283_s0 = scalar_lea.vmem %s158_s12, 256 }
  0x1a   :  { %v251_v27 = vpack.c.bf16 %v49_v26, %v48_v25  ;;  %v169_v34 = vld [vmem:[%s387_s3] ss:$0 sm:$0xff]  ;;  %p284_p8 = scmp.ne.s32.totalorder %s158_s12, %s283_s0  ;;  %p289_p10 = scmp.lt.s32.totalorder %s283_s0, %s283_s0 }
  0x1b   :  { %136 = vperm.xlu0 %260, %v128_v11  }
  0x1c   :  { %p290_p11 = por %p289_p10, %p288_p9 }
  0x1e   :  { %p291_p12 = pnand %p290_p11, %p284_p8 }
  0x1f   :  { %230 = vmatpush3.bf16.xpose.msra.mxu0 %v227_v6 }
  0x20   :  { %232 = vmatprep.subr.bf16.mxu0 %v231_v12 }
  0x27   :  { %234 = vmatpush3.bf16.xpose.msra.mxu0 %v231_v12 }
  0x28   :  { %236 = vmatprep.subr.bf16.mxu0 %v235_v15 }
  0x2f   :  { %238 = vmatpush3.bf16.xpose.msra.mxu0 %v235_v15 }
  0x30   :  { %240 = vmatprep.subr.bf16.mxu0 %v239_v18 }
  0x37   :  { %242 = vmatpush3.bf16.xpose.msra.mxu0 %v239_v18 }
  0x38   :  { %244 = vmatprep.subr.bf16.mxu0 %v243_v21 }
  0x3f   :  { %246 = vmatpush3.bf16.xpose.msra.mxu0 %v243_v21 }
  0x40   :  { %248 = vmatprep.subr.bf16.mxu0 %v247_v24 }
  0x47   :  { %250 = vmatpush3.bf16.xpose.msra.mxu0 %v247_v24 }
  0x48   :  { %252 = vmatprep.subr.bf16.mxu0 %v251_v27 }
  0x4f   :  { %254 = vmatpush3.bf16.xpose.msra.mxu0 %v251_v27 }
  0x56   :  { %221 = vmatmul.mubr.f32.vlgmr.msra.gmra.mrb[0].mxu0 %v33_v28 }
  0x96   :  { %v132_v29 = vpop.permute.xlu0 %131 }
  0x9a   :  { %v137_v33 = vpop.permute.xlu0 %136 }
 0x129   :  { %v222_v30 = vpop.f32.mrb[0].mxu0 }
 0x12a   :  { %v126_v31 = vmul.f32 -2.0, %v222_v30  ;;  %v116_v32 = vpop.f32.mrb[1].mxu0 }
 0x12b   :  { %v125_v35 = vmul.f32 -2.0, %v116_v32 }
 0x12c   :  { %v140_v36 = vadd.f32 %v137_v33, %v126_v31 }
 0x12d   :  { %v139_v37 = vadd.f32 %v132_v29, %v125_v35 }
 0x12e   :  { %v149_v38 = vadd.f32 %v169_v34, %v140_v36 }
 0x12f   :  { %v148_v39 = vadd.f32 %v169_v34, %v139_v37 }
 0x130   :  { %151 = vst [vmem:[#allocation5 + $0x8] sm:$0xff] %v149_v38 }
 0x131   :  { %150 = vst [vmem:[#allocation5] sm:$0xff] %v148_v39 }
 0x132   :  { %294 = shalt.err (!%p291_p12)
}
 0x133   :  { %s295_s3 = scalar_lea.hbm %s388_s4, 256 }
 0x134   :  { %p296_p13 = scmp.ne.s32.totalorder %s388_s4, %s295_s3  ;;  %p299_p0 = scmp.lt.u32.totalorder %s295_s3, %s388_s4 }
 0x136   :  { %p301_p1 = pnand %p299_p0, %p296_p13 }
 0x138   :  { %304 = shalt.err (!%p301_p1)
}
 0x139   :  { %163 = dma.vmem_to_hbm [thread:$0]  %s158_s12, 256, %s388_s4, [#allocation4], %s310_s25, %s310_s25, %s311_s26  }
 0x13a   :  { %307 = dma.done.wait [#allocation4], 256  }
 0x13b   :  { %308 = vsyncadd [#allocation4], 4294967040 }
 0x13c   :  { %167 = vsyncpa [#allocation3], 1 }
 0x13d   :  { %168 = vsyncpa [#allocation4], 1 }

</bundles_post_ra>
